<compile_context>
chip_gen: v6e
topology: v6e:2x2x1
jax: 0.10.0
libtpu: 0.0.40
codegen_flags: <defaults>
</compile_context>

<pallas_src>
import jax
import jax.numpy as jnp
from jax.experimental import pallas as pl
from jax.experimental.pallas import tpu as pltpu

_LANE = 128
# ~4 MiB input block -> double-buffered (in + out) working set stays well
# under the 16 MiB v5e scoped-VMEM default (and far under v6e/v7x limits).
_TARGET_IN_BLOCK_BYTES = 4 * 1024 * 1024


def _flatten_kernel(x_ref, o_ref):
    # x_ref: (1, C, TH, L) tile in VMEM; o_ref: (1, 1, TH, L) tile in VMEM.
    # Channel axis is a leading (non-vreg) dim -> plain per-lane VPU adds.
    # Cast back so integer dtypes (which jnp.sum promotes) store correctly.
    o_ref[...] = jnp.sum(x_ref[...], axis=1, keepdims=True).astype(o_ref.dtype)


def _choose_tile_rows(rows: int, row_bytes: int) -> int:
    """Largest multiple-of-8 divisor of `rows` whose input block is ~<= 4 MiB.

    Falls back to the full extent (always a legal block dim) when no such
    divisor exists (e.g. rows < 8, as in the small test shapes).
    """
    budget_rows = max(1, _TARGET_IN_BLOCK_BYTES // max(1, row_bytes))
    best = None
    t = 8
    limit = min(rows, budget_rows)
    while t <= limit:
        if rows % t == 0:
            best = t
        t += 8
    return best if best is not None else rows


def msfa_flatten(img: jax.Array) -> jax.Array:
    """Flatten a sparse multi-band image into a single-channel mosaic.

    Args:
        img: (N, C, H, W) or (C, H, W) array.

    Returns:
        (N, 1, H, W) or (1, H, W) array (singleton channel dimension kept),
        same dtype as the input.
    """
    squeeze_batch = False
    if img.ndim == 3:          # @_ensure_batch behaviour
        img = img[None]
        squeeze_batch = True
    assert img.ndim == 4, "expected NCHW or CHW input"

    n, c, h, w = img.shape
    itemsize = jnp.dtype(img.dtype).itemsize

    # Pick a lane-dense 2D view (rows, lanes) of the spatial plane.
    if w % _LANE == 0:
        rows, lanes = h, w
        x = img
        reshaped = False
    elif (h * w) % _LANE == 0:
        lanes = _LANE
        rows = (h * w) // _LANE
        x = img.reshape(n, c, rows, lanes)
        reshaped = True
    else:
        # Spatial plane can't be made lane-dense without padding; use the raw
        # layout (full-extent last dims are always legal block dims).
        rows, lanes = h, w
        x = img
        reshaped = False

    tile_rows = _choose_tile_rows(rows, c * lanes * itemsize)
    grid = (n, rows // tile_rows)

    out = pl.pallas_call(
        _flatten_kernel,
        out_shape=jax.ShapeDtypeStruct((n, 1, rows, lanes), img.dtype),
        grid_spec=pltpu.PrefetchScalarGridSpec(
            num_scalar_prefetch=0,
            grid=grid,
            in_specs=[
                pl.BlockSpec((1, c, tile_rows, lanes),
                             lambda i, j: (i, 0, j, 0)),
            ],
            out_specs=pl.BlockSpec((1, 1, tile_rows, lanes),
                                   lambda i, j: (i, 0, j, 0)),
        ),
        compiler_params=pltpu.CompilerParams(
            dimension_semantics=("parallel", "parallel"),
        ),
    )(x)

    if reshaped:
        out = out.reshape(n, 1, h, w)
    if squeeze_batch:
        out = out[0]
    return out


if __name__ == "__main__":
    key = jax.random.PRNGKey(0)
    N, C, H, W = 2, 4, 16, 16

    # Build a deterministic sparse multi-band image like an MSFA output:
    # each channel is non-zero only on its own 2x2 Bayer-like pattern cell.
    dense = jax.random.uniform(key, (N, C, H, W), dtype=jnp.float32)
    ii = jnp.arange(H)[:, None]
    jj = jnp.arange(W)[None, :]
    pattern = (ii % 2) * 2 + (jj % 2)                     # (H, W) values in [0, C)
    mask = (pattern[None, None, :, :] == jnp.arange(C)[None, :, None, None])
    img = dense * mask.astype(dense.dtype)                # sparse multi-band image

    # Batched path.
    out = msfa_flatten(img)
    jax.block_until_ready(out)
    ref = jnp.sum(img, axis=1, keepdims=True)
    assert out.shape == (N, 1, H, W), out.shape
    assert out.dtype == img.dtype
    assert jnp.allclose(out, ref, atol=1e-6), "mismatch vs reference (batched)"

    # Unbatched path (mirrors @_ensure_batch).
    out1 = msfa_flatten(img[0])
    jax.block_until_ready(out1)
    ref1 = jnp.sum(img[0], axis=0, keepdims=True)
    assert out1.shape == (1, H, W), out1.shape
    assert jnp.allclose(out1, ref1, atol=1e-6), "mismatch vs reference (unbatched)"

    # Narrow-dtype path (bf16 sensor data stays bf16 end-to-end).
    img_bf16 = img.astype(jnp.bfloat16)
    out_bf16 = msfa_flatten(img_bf16)
    jax.block_until_ready(out_bf16)
    ref_bf16 = jnp.sum(img_bf16, axis=1, keepdims=True).astype(jnp.bfloat16)
    assert out_bf16.dtype == jnp.bfloat16
    assert jnp.allclose(out_bf16.astype(jnp.float32),
                        ref_bf16.astype(jnp.float32), atol=1e-2), "bf16 mismatch"

    # Odd-width fallback path (full-extent last dims, no lane reshape).
    img_odd = dense[:, :, :, :15]
    out_odd = msfa_flatten(img_odd)
    jax.block_until_ready(out_odd)
    ref_odd = jnp.sum(img_odd, axis=1, keepdims=True)
    assert out_odd.shape == (N, 1, H, 15), out_odd.shape
    assert jnp.allclose(out_odd, ref_odd, atol=1e-6), "mismatch (odd width)"

    print("KERNEL_OK")
</pallas_src>

<mosaic_0001>
module attributes {stable_mosaic.version = 11 : i64} {
  func.func @_flatten_kernel(%arg0: i32, %arg1: i32, %arg2: memref<1x4x2x128xf32, #tpu.memory_space<vmem>>, %arg3: memref<1x1x2x128xf32, #tpu.memory_space<vmem>>) attributes {dimension_semantics = [#tpu.dimension_semantics<parallel>, #tpu.dimension_semantics<parallel>], iteration_bounds = array<i64: 2, 1>, scalar_prefetch = 0 : i64, scratch_operands = 0 : i64, tpu.core_type = #tpu.core_type<tc>, window_params = [{transform_indices = @transform_0, window_bounds = array<i64: 1, 4, 2, 128>}, {transform_indices = @transform_1, window_bounds = array<i64: 1, 1, 2, 128>}]} {
    %c0 = arith.constant 0 : index
    %c0_0 = arith.constant 0 : index
    %c0_1 = arith.constant 0 : index
    %c0_2 = arith.constant 0 : index
    %0 = vector.load %arg2[%c0, %c0_0, %c0_1, %c0_2] : memref<1x4x2x128xf32, #tpu.memory_space<vmem>>, vector<1x4x2x128xf32>
    %cst = arith.constant dense<0.000000e+00> : vector<1x2x128xf32>
    %1 = vector.multi_reduction <add>, %0, %cst [1] : vector<1x4x2x128xf32> to vector<1x2x128xf32>
    %2 = vector.shape_cast %1 : vector<1x2x128xf32> to vector<1x1x2x128xf32>
    %c0_3 = arith.constant 0 : index
    %c0_4 = arith.constant 0 : index
    %c0_5 = arith.constant 0 : index
    %c0_6 = arith.constant 0 : index
    %3 = vector.load %arg3[%c0_3, %c0_4, %c0_5, %c0_6] : memref<1x1x2x128xf32, #tpu.memory_space<vmem>>, vector<1x1x2x128xf32>
    tpu.vector_store %arg3[%c0_3, %c0_4, %c0_5, %c0_6], %2 {strides = array<i32>} : memref<1x1x2x128xf32, #tpu.memory_space<vmem>>, vector<1x1x2x128xf32>,
    return
  }
  func.func @transform_0(%arg0: i32, %arg1: i32) -> (i32, i32, i32, i32) {
    %c0_i32 = arith.constant 0 : i32
    %c0_i32_0 = arith.constant 0 : i32
    %c0_i32_1 = arith.constant 0 : i32
    return %arg0, %c0_i32, %arg1, %c0_i32_0 : i32, i32, i32, i32
  }
  func.func @transform_1(%arg0: i32, %arg1: i32) -> (i32, i32, i32, i32) {
    %c0_i32 = arith.constant 0 : i32
    %c0_i32_0 = arith.constant 0 : i32
    %c0_i32_1 = arith.constant 0 : i32
    return %arg0, %c0_i32, %arg1, %c0_i32_0 : i32, i32, i32, i32
  }
}

</mosaic_0001>

<bundles_post_ra>
// kernel: tpu_custom_call.1
= control target key start
LH: loop header
LB: loop body
LE: loop exit
PB: predicated region body
PF: predicated region fallthrough
CT: control target
= control target key end

     0   :  { %6 = vsyncpa [#allocation3], 0  ;;  %s597_s0 = inlined_call_operand.hbm [shape: f32[2,4,2,128], index: 0, kind: input, shape index: {}]   ;;  %s598_s1 = inlined_call_operand.hbm [shape: f32[2,1,2,128], index: 1, kind: output, shape index: {}]  }
   0x1   :  { %8 = vsyncpa [#allocation3 + $0x1], 0 }
   0x2   :  { %9 = vsyncpa [#allocation4], 0 }
   0x3   :  { %11 = vsyncpa [#allocation4 + $0x1], 0  ;;  %s464_s6 = smov 0   ;;  %s466_s7 = smov 0  }
   0x4   :  { %s468_s8 = smov 0   ;;  %s470_s9 = smov 0  }
   0x5   :  { %s472_s10 = smov 0   ;;  %s474_s11 = smov 0  }
   0x6 LB: > { %s261_s12 = sadd.s32 4294967295, %s448_s11   ;;  %s262_s13 = sadd.s32 4294967294, %s448_s11   ;;  %s448_s11 = sphi %s474_s11, %s17_s11   ;;  %s444_s10 = sphi %s472_s10, %s609_s10   ;;  %s440_s9 = sphi %s470_s9, %s608_s9   ;;  %s436_s8 = sphi %s468_s8, %s607_s8   ;;  %s432_s7 = sphi %s466_s7, %s606_s7   ;;  %s428_s6 = sphi %s464_s6, %s605_s6  }
   0x7   : > { %s29_s14 = sadd.s32 1, %s444_s10  ;;  %s38_s15 = sadd.s32 1, %s436_s8 }
   0x8   : > { %p31_p0 = scmp.ge.s32.totalorder %s29_s14, 2  ;;  %p45_p1 = scmp.ne.s32.totalorder %s436_s8, %s432_s7 }
   0x9   : > { %p46_p2 = scmp.eq.s32.totalorder %s448_s11, 0  ;;  %p51_p3 = scmp.ne.s32.totalorder %s432_s7, %s428_s6 }
   0xa   : > { %s611_s14 = smov (%p31_p0, %s29_s14), 0  ;;  %p52_p5 = scmp.eq.s32.totalorder %s261_s12, 0 }
   0xb   : > { %p505_p4 = por %p46_p2, %p45_p1  ;;  %s33_s17 = ssub.s32 %s444_s10, %s611_s14 }
   0xc   : > { %p77_p6 = scmp.eq.s32.totalorder %s261_s12, 1  ;;  %p36_p7 = scmp.eq.s32.totalorder %s33_s17, 0 }
   0xd   : > { %p511_p8 = por %p52_p5, %p51_p3  ;;  %p83_p10 = scmp.eq.s32.totalorder %s262_s13, 1 }
   0xe   : > { %p515_p9 = por %p77_p6, %p45_p1  ;;  %p288_p13 = scmp.lt.s32.totalorder %s448_s11, 2 }
   0xf   : > { %s520_s20 = scalar_select %p36_p7, %s436_s8, %s38_s15  }
  0x10   : > { %p522_p11 = por %p83_p10, %p51_p3  ;;  %s103_s22 = sand.u32 1, %s436_s8  }
  0x11   : > { %s265_s23 = sshll.u32 %s103_s22, 3  ;;  %s275_s24 = sshll.u32 %s444_s10, 7 }
  0x12   : > { %s114_s27 = scalar_lea.hbm %s597_s0, %s275_s24  ;;  %s107_s28 = scalar_lea.vmem [#allocation2], %s265_s23 }
  0x13   : > { %s115_s29 = sshll.u32 %s107_s28, 4  ;;  %p535_p0 = pnand %p288_p13, %p505_p4  ;;  %s116_s29 = int_to_ptr.vmem [resolvable:$true] %s115_s29 }
  0x14   : > { %p268_p1 = scmp.ge.s32.totalorder %s448_s11, 1  ;;  %s104_s2 = scalar_lea.sflag [#allocation3], %s103_s22 }
  0x15   : > { %p342_p2 = pneg %p535_p0  ;;  %s353_s3 = scalar_lea.vmem %s116_s29, 128 }
  0x16   : > { %p354_p3 = scmp.ne.s32.totalorder %s116_s29, %s353_s3  ;;  %s450_s4 = smov [#allocation2]  }
  0x17   : > { %s358_s5 = sshll.u32 %s450_s4, 4  ;;  %s359_s5 = int_to_ptr.vmem [resolvable:$false] %s358_s5 }
  0x18   : > { %p356_p5 = pnand %p354_p3, %p342_p2  ;;  %s360_s12 = scalar_lea.vmem %s359_s5, 256 }
  0x19   : > { %p361_p7 = scmp.lt.s32.totalorder %s116_s29, %s359_s5  ;;  %p362_p10 = scmp.lt.s32.totalorder %s360_s12, %s353_s3 }
  0x1a   : > { %p357_p6 = pneg %p356_p5 }
  0x1b   : > { %p363_p12 = por %p362_p10, %p361_p7 }
  0x1d   : > { %p364_p4 = pnand %p363_p12, %p357_p6 }
  0x1f   : > { %367 = shalt.err (!%p364_p4)
}
  0x20   : > { %s451_s13 = smov 32   ;;  %s452_s15 = smov 2  }
  0x21   : > { %283 = dma.hbm_to_vmem [thread:$0]  (!%p535_p0), %s114_s27, 128, %s116_s29, %s104_s2, %s451_s13, %s451_s13, %s452_s15  }
  0x22   : > { %p123_p13 = scmp.lt.s32.totalorder %s448_s11, 3 }
  0x24   : > { %p124_p2 = pnand %p268_p1, %p123_p13 }
  0x25   : > { %s548_s16 = sand.u32 (!%p124_p2), 1, %s432_s7  }
  0x26   : > { %127 = sbr.rel (%p124_p2) target bundleno = 69 (0x45), region = 24  ;;  %s269_s17 = sshll.u32 (!%p124_p2), %s548_s16, 3 }
  0x27   : > { %s130_s22 = scalar_lea.sflag (!%p124_p2), [#allocation3], %s548_s16  ;;  %s133_s23 = scalar_lea.vmem (!%p124_p2), [#allocation2], %s269_s17 }
  0x2b   : > { %419 = dma.done.wait (%p511_p8), %s130_s22, 128  }
  0x2c   : > { %421 = vsyncadd (%p511_p8), %s130_s22, 4294967168  ;;  %s270_s24 = sshll.u32 %s548_s16, 1  ;;  %vm156_vm0 = vcmask 1041408   ;;  %v152_v0 = vld [vmem:[%s133_s23] sm:$0x3]  ;;  %s272_s27 = sshll.u32 %s440_s9, 5 }
  0x2d   : > { %v153_v1 = vld [vmem:[%s133_s23 + $0x2] sm:$0x3]  ;;  %v154_v2 = vld [vmem:[%s133_s23 + $0x4] sm:$0x3]  ;;  %v155_v3 = vld [vmem:[%s133_s23 + $0x6] sm:$0x3]  ;;  %s178_s29 = scalar_lea.hbm %s598_s1, %s272_s27 }
  0x2e   : > { %v157_v4 = vsel %vm156_vm0, %v152_v0, 0.0  ;;  %v158_v5 = vsel %vm156_vm0, %v153_v1, 0.0  ;;  %v160_v6 = vsel %vm156_vm0, %v154_v2, 0.0  ;;  %v162_v8 = vsel %vm156_vm0, %v155_v3, 0.0  ;;  %s151_s25 = scalar_lea.vmem [#allocation5], %s270_s24  ;;  %s166_s30 = scalar_lea.sflag [#allocation4], %s548_s16 }
  0x2f   : > { %v159_v7 = vadd.f32 %v158_v5, %v157_v4  ;;  %s180_s26 = sshll.u32 %s151_s25, 4  ;;  %s453_s3 = smov [#allocation5]   ;;  %s181_s26 = int_to_ptr.vmem [resolvable:$true] %s180_s26 }
  0x30   : > { %s368_s2 = scalar_lea.vmem %s181_s26, 32  ;;  %s372_s4 = sshll.u32 %s453_s3, 4  ;;  %s373_s4 = int_to_ptr.vmem [resolvable:$false] %s372_s4 }
  0x31   : > { %v161_v9 = vadd.f32 %v160_v6, %v159_v7  ;;  %p369_p8 = scmp.ne.s32.totalorder %s181_s26, %s368_s2  ;;  %s374_s5 = scalar_lea.vmem %s373_s4, 64 }
  0x32   : > { %p375_p1 = scmp.lt.s32.totalorder %s181_s26, %s373_s4  ;;  %p376_p3 = scmp.lt.s32.totalorder %s374_s5, %s368_s2 }
  0x33   : > { %v163_v10 = vadd.f32 %v162_v8, %v161_v9  ;;  %p370_p12 = pnand %p369_p8, %p515_p9 }
  0x34   : > { %p377_p5 = por %p376_p3, %p375_p1 }
  0x35   : > { %164 = vst [vmem:[%s151_s25] sm:$0x3] %v163_v10  ;;  %p371_p0 = pneg %p370_p12 }
  0x37   : > { %p378_p6 = pnand %p377_p5, %p371_p0 }
  0x39   : > { %381 = shalt.err (!%p378_p6)
}
  0x3a   : > { %s382_s9 = scalar_lea.hbm %s178_s29, 32  ;;  %s386_s15 = scalar_lea.hbm %s598_s1, 64 }
  0x3b   : > { %p383_p7 = scmp.ne.s32.totalorder %s178_s29, %s382_s9  ;;  %p387_p13 = scmp.lt.s32.totalorder %s178_s29, %s598_s1 }
  0x3c   : > { %p388_p2 = scmp.lt.s32.totalorder %s386_s15, %s382_s9 }
  0x3d   : > { %p384_p10 = pnand %p383_p7, %p515_p9 }
  0x3e   : > { %p389_p8 = por %p388_p2, %p387_p13 }
  0x3f   : > { %p385_p4 = pneg %p384_p10 }
  0x41   : > { %p390_p12 = pnand %p389_p8, %p385_p4 }
  0x43   : > { %393 = shalt.err (!%p390_p12)
}
  0x44   : > { %278 = dma.vmem_to_hbm [thread:$0]  (%p515_p9), %s181_s26, 32, %s178_s29, %s166_s30  }
  0x45 PF: > { %s192_s22 = sand.u32 1, %s428_s6   ;;  %p604_p0 = scmp.ge.s32.totalorder %s448_s11, 2 }
  0x46   : > { %s193_s23 = scalar_lea.sflag [#allocation4], %s192_s22 }
  0x47   : > { %p285_p1 = pnand %p604_p0, %p522_p11 }
  0x49   : > { %p286_p3 = pneg %p285_p1 }
  0x4b   : > { %423 = dma.done.wait (%p286_p3), %s193_s23, 32  }
  0x4c   : > { %425 = vsyncadd (%p286_p3), %s193_s23, 4294967264  ;;  %s17_s11 = sadd.s32 1, %s448_s11   ;;  %s605_s6 = smov %s432_s7 }
  0x4d   : > { %p14_p5 = scmp.ge.s32.totalorder %s17_s11, 4   ;;  %s606_s7 = smov %s436_s8 }
  0x4e   : > { %s607_s8 = smov %s520_s20  ;;  %s608_s9 = smov %s444_s10 }
  0x4f   : > { %s609_s10 = smov %s611_s14  ;;  %16 = sbr.rel (!%p14_p5) target bundleno = 6 (0x6), region = 69 }
  0x54   :  { %198 = vsyncpa [#allocation3], 1 }
  0x55   :  { %200 = vsyncpa [#allocation3 + $0x1], 1 }
  0x56   :  { %201 = vsyncpa [#allocation4], 1 }
  0x57   :  { %203 = vsyncpa [#allocation4 + $0x1], 1 }

</bundles_post_ra>
